<compile_context>
chip_gen: v7x
topology: tpu7x:2x2x1
jax: 0.10.0
libtpu: 0.0.40
codegen_flags: <defaults>
</compile_context>

<pallas_src>
import math
import functools

import jax
import jax.numpy as jnp
from jax.experimental import pallas as pl
from jax.experimental.pallas import tpu as pltpu


def _round_up(x, m):
    return (x + m - 1) // m * m


# ---------------------------------------------------------------------------
# Kernel
# ---------------------------------------------------------------------------
def _share_lstm_cell_kernel(b_pad, hp, share,
                            z_ref, c_ref, m_ref, w_ref, bias_ref, out_ref):
    # One fused MXU contraction: (B, K) @ (K, (4+share)*Hp), f32 accumulation,
    # bias already pre-summed (bias_ih + bias_hh / bias_sh) in the wrapper.
    acts = jnp.dot(z_ref[...], w_ref[...],
                   preferred_element_type=jnp.float32) + bias_ref[...]

    # Lane layout of acts (each chunk Hp = multiple of 128 lanes wide):
    #   [ i | f | o | c_hat | b_0 ... b_{share-1} ]
    ifo = jax.nn.sigmoid(acts[:, :3 * hp])
    i = ifo[:, 0 * hp:1 * hp]
    f = ifo[:, 1 * hp:2 * hp]
    o = ifo[:, 2 * hp:3 * hp]
    c_hat = acts[:, 3 * hp:4 * hp]

    # Hoist the (B,1) -> (B,Hp) mask broadcast once and reuse it everywhere.
    m = jnp.broadcast_to(m_ref[...], (b_pad, hp))

    c_t = (f * c_ref[...] + i * jnp.tanh(c_hat)) * m
    tanh_c_m = jnp.tanh(c_t) * m

    # Single lane-dense output slab: [ h | c_t | s_0 ... s_{share-1} ],
    # every chunk written with an aligned, unmasked 128+-lane store.
    out_ref[:, 0 * hp:1 * hp] = o * tanh_c_m
    out_ref[:, 1 * hp:2 * hp] = c_t
    for k in range(share):
        b_k = jax.nn.sigmoid(acts[:, (4 + k) * hp:(5 + k) * hp])
        out_ref[:, (2 + k) * hp:(3 + k) * hp] = b_k * tanh_c_m


# ---------------------------------------------------------------------------
# One-time parameter packing (done once per model, outside the step loop)
# ---------------------------------------------------------------------------
def prepare_fused_params(params, d_in, d_hid, share, compute_dtype=jnp.bfloat16):
    """Pack W_ih/W_hh/W_sh into a single block weight and one bias row.

    Returns dict with:
      w_fused: (d_in + 2*d_hid, (4+share)*Hp)  in `compute_dtype`
      b_fused: (1, (4+share)*Hp)               f32
    Gate chunks are padded from d_hid to Hp = round_up(d_hid, 128) lanes.
    """
    num_gate = 4 + share
    hp = _round_up(d_hid, 128)
    kc = d_in + 2 * d_hid
    n_cols = num_gate * hp

    wih_t = params["weight_ih"].T.astype(jnp.float32)   # (d_in,  num_gate*d_hid)
    whh_t = params["weight_hh"].T.astype(jnp.float32)   # (d_hid, 4*d_hid)
    wsh_t = params["weight_sh"].T.astype(jnp.float32)   # (d_hid, share*d_hid)

    w = jnp.zeros((kc, n_cols), jnp.float32)
    for g in range(num_gate):
        w = w.at[:d_in, g * hp:g * hp + d_hid].set(
            wih_t[:, g * d_hid:(g + 1) * d_hid])
    for g in range(4):
        w = w.at[d_in:d_in + d_hid, g * hp:g * hp + d_hid].set(
            whh_t[:, g * d_hid:(g + 1) * d_hid])
    for k in range(share):
        g = 4 + k
        w = w.at[d_in + d_hid:kc, g * hp:g * hp + d_hid].set(
            wsh_t[:, k * d_hid:(k + 1) * d_hid])

    b = jnp.zeros((1, n_cols), jnp.float32)
    for g in range(num_gate):
        bg = params["bias_ih"][g * d_hid:(g + 1) * d_hid]
        if g < 4:
            bg = bg + params["bias_hh"][g * d_hid:(g + 1) * d_hid]
        else:
            bg = bg + params["bias_sh"][(g - 4) * d_hid:(g - 3) * d_hid]
        b = b.at[0, g * hp:g * hp + d_hid].set(bg)

    return {"w_fused": w.astype(compute_dtype), "b_fused": b}


# ---------------------------------------------------------------------------
# Forward wrapper
# ---------------------------------------------------------------------------
@functools.partial(jax.jit, static_argnames=("idx", "d_hid", "compute_dtype"))
def share_lstm_cell_forward(fused, x, h_minors, c_minors, s_minors, mask, idx,
                            *, d_hid, compute_dtype=jnp.bfloat16):
    """JAX/Pallas equivalent of Share_lstm_cell.forward.

    x:        (B, d_in);  h_minors, c_minors: (B, d_hid)
    s_minors: list of `share` arrays, each (B, d_hid)
    mask:     (B,)  (PyTorch does mask.unsqueeze(1))
    idx:      python int selecting which shared state feeds W_sh
    returns:  h (B, d_hid), c_t (B, d_hid), s = [(B, d_hid)] * share
    """
    B, d_in = x.shape
    share = len(s_minors)
    hp = _round_up(d_hid, 128)
    b_pad = _round_up(B, 8)
    n_out = (2 + share) * hp

    # Fused LHS [x | h | s_idx] in compute dtype, batch padded to 8 sublanes.
    z = jnp.concatenate(
        [x.astype(jnp.float32), h_minors.astype(jnp.float32),
         s_minors[idx].astype(jnp.float32)], axis=1).astype(compute_dtype)
    z = jnp.pad(z, ((0, b_pad - B), (0, 0)))

    c_p = jnp.pad(c_minors.astype(jnp.float32),
                  ((0, b_pad - B), (0, hp - d_hid)))
    m_p = jnp.pad(mask.astype(jnp.float32)[:, None], ((0, b_pad - B), (0, 0)))

    kernel = functools.partial(_share_lstm_cell_kernel, b_pad, hp, share)

    def full(shape):
        return pl.BlockSpec(shape, lambda *_: (0,) * len(shape))

    out = pl.pallas_call(
        kernel,
        grid=(1,),
        in_specs=[
            full(z.shape),                       # (B_pad, d_in + 2*d_hid) bf16
            full(c_p.shape),                     # (B_pad, Hp)             f32
            full(m_p.shape),                     # (B_pad, 1)              f32
            full(fused["w_fused"].shape),        # (K, (4+share)*Hp)       bf16
            full(fused["b_fused"].shape),        # (1, (4+share)*Hp)       f32
        ],
        out_specs=full((b_pad, n_out)),
        out_shape=jax.ShapeDtypeStruct((b_pad, n_out), jnp.float32),
        compiler_params=pltpu.CompilerParams(
            dimension_semantics=("arbitrary",)),
    )(z, c_p, m_p, fused["w_fused"], fused["b_fused"])

    h = out[:B, 0:d_hid]
    c_t = out[:B, hp:hp + d_hid]
    s = [out[:B, (2 + k) * hp:(2 + k) * hp + d_hid] for k in range(share)]
    return h, c_t, s


# ---------------------------------------------------------------------------
# Pure-JAX reference (mirrors the PyTorch forward)
# ---------------------------------------------------------------------------
def _reference_forward(params, x, h_minors, c_minors, s_minors, mask, idx,
                       matmul_dtype=jnp.float32):
    d_hid = h_minors.shape[1]
    share = len(s_minors)
    m = mask.astype(jnp.float32)[:, None]

    def mm(a, w):
        return jnp.dot(a.astype(matmul_dtype), w.astype(matmul_dtype).T,
                       preferred_element_type=jnp.float32)

    tmp = mm(x, params["weight_ih"]) + params["bias_ih"]
    tmp2 = mm(h_minors, params["weight_hh"]) + params["bias_hh"]
    tmp3 = mm(s_minors[idx], params["weight_sh"]) + params["bias_sh"]
    tmp_in, tmp_s = tmp[:, :4 * d_hid], tmp[:, 4 * d_hid:]
    pre = tmp_in + tmp2
    ifob, c_hat = pre[:, :3 * d_hid], pre[:, 3 * d_hid:]
    b = jax.nn.sigmoid(tmp_s + tmp3)
    i = jax.nn.sigmoid(ifob[:, :d_hid])
    f = jax.nn.sigmoid(ifob[:, d_hid:2 * d_hid])
    o = jax.nn.sigmoid(ifob[:, 2 * d_hid:])
    c_t = (f * c_minors + i * jnp.tanh(c_hat)) * m
    h = o * jnp.tanh(c_t) * m
    s = [b[:, k * d_hid:(k + 1) * d_hid] * jnp.tanh(c_t) * m
         for k in range(share)]
    return h, c_t, s


def init_params(key, d_in, d_hid, share):
    """uniform(-stdv, stdv) init, stdv = 1/sqrt(d_hid) (as in reset_parameters)."""
    num_gate = 4 + share
    stdv = 1.0 / math.sqrt(d_hid)
    ks = jax.random.split(key, 6)
    u = lambda k, shp: jax.random.uniform(k, shp, jnp.float32, -stdv, stdv)
    return {
        "weight_ih": u(ks[0], (num_gate * d_hid, d_in)),
        "weight_hh": u(ks[1], (4 * d_hid, d_hid)),
        "weight_sh": u(ks[2], (share * d_hid, d_hid)),
        "bias_ih": u(ks[3], (num_gate * d_hid,)),
        "bias_hh": u(ks[4], (4 * d_hid,)),
        "bias_sh": u(ks[5], (share * d_hid,)),
    }


if __name__ == "__main__":
    B, D_IN, D_HID, SHARE = 8, 16, 32, 2
    IDX = 1

    key = jax.random.PRNGKey(0)
    kp, kx, kh, kc, ks0, ks1, km = jax.random.split(key, 7)

    params = init_params(kp, D_IN, D_HID, SHARE)
    x = jax.random.normal(kx, (B, D_IN), jnp.float32)
    h_minors = jax.random.normal(kh, (B, D_HID), jnp.float32)
    c_minors = jax.random.normal(kc, (B, D_HID), jnp.float32)
    s_minors = [
        jax.random.normal(ks0, (B, D_HID), jnp.float32),
        jax.random.normal(ks1, (B, D_HID), jnp.float32),
    ]
    mask = (jax.random.uniform(km, (B,)) > 0.25).astype(jnp.float32)

    fused = prepare_fused_params(params, D_IN, D_HID, SHARE)
    h, c_t, s = share_lstm_cell_forward(
        fused, x, h_minors, c_minors, s_minors, mask, IDX, d_hid=D_HID)
    jax.block_until_ready((h, c_t, s))

    # Tight check against a reference that mirrors the kernel's bf16 matmuls.
    h_r, c_r, s_r = _reference_forward(
        params, x, h_minors, c_minors, s_minors, mask, IDX,
        matmul_dtype=jnp.bfloat16)
    assert jnp.allclose(h, h_r, atol=1e-4, rtol=1e-4)
    assert jnp.allclose(c_t, c_r, atol=1e-4, rtol=1e-4)
    for a, b in zip(s, s_r):
        assert jnp.allclose(a, b, atol=1e-4, rtol=1e-4)

    # Loose sanity check against exact f32 PyTorch semantics.
    h_f, c_f, s_f = _reference_forward(
        params, x, h_minors, c_minors, s_minors, mask, IDX,
        matmul_dtype=jnp.float32)
    assert jnp.allclose(h, h_f, atol=1e-1, rtol=1e-1)
    assert jnp.allclose(c_t, c_f, atol=1e-1, rtol=1e-1)
    for a, b in zip(s, s_f):
        assert jnp.allclose(a, b, atol=1e-1, rtol=1e-1)

    print("KERNEL_OK")
</pallas_src>

<mosaic_0001>
module attributes {stable_mosaic.version = 11 : i64} {
  func.func @_share_lstm_cell_kernel(%arg0: i32, %arg1: memref<8x80xbf16, #tpu.memory_space<vmem>>, %arg2: memref<8x128xf32, #tpu.memory_space<vmem>>, %arg3: memref<8x1xf32, #tpu.memory_space<vmem>>, %arg4: memref<80x768xbf16, #tpu.memory_space<vmem>>, %arg5: memref<1x768xf32, #tpu.memory_space<vmem>>, %arg6: memref<8x512xf32, #tpu.memory_space<vmem>>) attributes {dimension_semantics = [#tpu.dimension_semantics<arbitrary>], iteration_bounds = array<i64: 1>, scalar_prefetch = 0 : i64, scratch_operands = 0 : i64, tpu.core_type = #tpu.core_type<tc>, window_params = [{pipeline_mode = #tpu.pipeline_mode<synchronous>, transform_indices = @transform_0, window_bounds = array<i64: 8, 80>}, {pipeline_mode = #tpu.pipeline_mode<synchronous>, transform_indices = @transform_1, window_bounds = array<i64: 8, 128>}, {pipeline_mode = #tpu.pipeline_mode<synchronous>, transform_indices = @transform_2, window_bounds = array<i64: 8, 1>}, {pipeline_mode = #tpu.pipeline_mode<synchronous>, transform_indices = @transform_3, window_bounds = array<i64: 80, 768>}, {pipeline_mode = #tpu.pipeline_mode<synchronous>, transform_indices = @transform_4, window_bounds = array<i64: 1, 768>}, {pipeline_mode = #tpu.pipeline_mode<synchronous>, transform_indices = @transform_5, window_bounds = array<i64: 8, 512>}]} {
    %c0 = arith.constant 0 : index
    %c0_0 = arith.constant 0 : index
    %0 = vector.load %arg1[%c0, %c0_0] : memref<8x80xbf16, #tpu.memory_space<vmem>>, vector<8x80xbf16>
    %c0_1 = arith.constant 0 : index
    %c0_2 = arith.constant 0 : index
    %1 = vector.load %arg4[%c0_1, %c0_2] : memref<80x768xbf16, #tpu.memory_space<vmem>>, vector<80x768xbf16>
    %cst = arith.constant dense<0.000000e+00> : vector<8x768xf32>
    %2 = tpu.matmul %0, %1, %cst {dimension_numbers = #tpu.dot_dimension_numbers<[1], [0], [0], [1], [0, 0, 1, 1], [], []>} : vector<8x80xbf16>, vector<80x768xbf16>, vector<8x768xf32> -> vector<8x768xf32>
    %c0_3 = arith.constant 0 : index
    %c0_4 = arith.constant 0 : index
    %3 = vector.load %arg5[%c0_3, %c0_4] : memref<1x768xf32, #tpu.memory_space<vmem>>, vector<1x768xf32>
    %4 = vector.broadcast %3 : vector<1x768xf32> to vector<8x768xf32>
    %5 = arith.addf %2, %4 : vector<8x768xf32>
    %6 = vector.extract_strided_slice %5 {offsets = [0, 0], sizes = [8, 384], strides = [1, 1]} : vector<8x768xf32> to vector<8x384xf32>
    %7 = arith.negf %6 : vector<8x384xf32>
    %8 = math.exp %7 : vector<8x384xf32>
    %cst_5 = arith.constant 1.000000e+00 : f32
    %9 = vector.broadcast %cst_5 : f32 to vector<8x384xf32>
    %10 = arith.addf %9, %8 : vector<8x384xf32>
    %11 = arith.divf %9, %10 : vector<8x384xf32>
    %12 = vector.extract_strided_slice %11 {offsets = [0, 0], sizes = [8, 128], strides = [1, 1]} : vector<8x384xf32> to vector<8x128xf32>
    %13 = vector.extract_strided_slice %11 {offsets = [0, 128], sizes = [8, 128], strides = [1, 1]} : vector<8x384xf32> to vector<8x128xf32>
    %14 = vector.extract_strided_slice %11 {offsets = [0, 256], sizes = [8, 128], strides = [1, 1]} : vector<8x384xf32> to vector<8x128xf32>
    %15 = vector.extract_strided_slice %5 {offsets = [0, 384], sizes = [8, 128], strides = [1, 1]} : vector<8x768xf32> to vector<8x128xf32>
    %c0_6 = arith.constant 0 : index
    %c0_7 = arith.constant 0 : index
    %16 = vector.load %arg3[%c0_6, %c0_7] : memref<8x1xf32, #tpu.memory_space<vmem>>, vector<8x1xf32>
    %17 = vector.shape_cast %16 : vector<8x1xf32> to vector<8x1xf32>
    %18 = vector.broadcast %17 : vector<8x1xf32> to vector<8x128xf32>
    %c0_8 = arith.constant 0 : index
    %c0_9 = arith.constant 0 : index
    %19 = vector.load %arg2[%c0_8, %c0_9] : memref<8x128xf32, #tpu.memory_space<vmem>>, vector<8x128xf32>
    %20 = arith.mulf %13, %19 : vector<8x128xf32>
    %21 = math.tanh %15 : vector<8x128xf32>
    %22 = arith.mulf %12, %21 : vector<8x128xf32>
    %23 = arith.addf %20, %22 : vector<8x128xf32>
    %24 = arith.mulf %23, %18 : vector<8x128xf32>
    %25 = math.tanh %24 : vector<8x128xf32>
    %26 = arith.mulf %25, %18 : vector<8x128xf32>
    %27 = arith.mulf %14, %26 : vector<8x128xf32>
    %c0_10 = arith.constant 0 : index
    %c0_11 = arith.constant 0 : index
    %28 = vector.load %arg6[%c0_10, %c0_11] : memref<8x512xf32, #tpu.memory_space<vmem>>, vector<8x128xf32>
    tpu.vector_store %arg6[%c0_10, %c0_11], %27 {strides = array<i32>} : memref<8x512xf32, #tpu.memory_space<vmem>>, vector<8x128xf32>,
    %c0_12 = arith.constant 0 : index
    %c128 = arith.constant 128 : index
    %29 = vector.load %arg6[%c0_12, %c128] : memref<8x512xf32, #tpu.memory_space<vmem>>, vector<8x128xf32>
    tpu.vector_store %arg6[%c0_12, %c128], %24 {strides = array<i32>} : memref<8x512xf32, #tpu.memory_space<vmem>>, vector<8x128xf32>,
    %30 = vector.extract_strided_slice %5 {offsets = [0, 512], sizes = [8, 128], strides = [1, 1]} : vector<8x768xf32> to vector<8x128xf32>
    %31 = arith.negf %30 : vector<8x128xf32>
    %32 = math.exp %31 : vector<8x128xf32>
    %cst_13 = arith.constant 1.000000e+00 : f32
    %33 = vector.broadcast %cst_13 : f32 to vector<8x128xf32>
    %34 = arith.addf %33, %32 : vector<8x128xf32>
    %35 = arith.divf %33, %34 : vector<8x128xf32>
    %36 = arith.mulf %35, %26 : vector<8x128xf32>
    %c0_14 = arith.constant 0 : index
    %c256 = arith.constant 256 : index
    %37 = vector.load %arg6[%c0_14, %c256] : memref<8x512xf32, #tpu.memory_space<vmem>>, vector<8x128xf32>
    tpu.vector_store %arg6[%c0_14, %c256], %36 {strides = array<i32>} : memref<8x512xf32, #tpu.memory_space<vmem>>, vector<8x128xf32>,
    %38 = vector.extract_strided_slice %5 {offsets = [0, 640], sizes = [8, 128], strides = [1, 1]} : vector<8x768xf32> to vector<8x128xf32>
    %39 = arith.negf %38 : vector<8x128xf32>
    %40 = math.exp %39 : vector<8x128xf32>
    %cst_15 = arith.constant 1.000000e+00 : f32
    %41 = vector.broadcast %cst_15 : f32 to vector<8x128xf32>
    %42 = arith.addf %41, %40 : vector<8x128xf32>
    %43 = arith.divf %41, %42 : vector<8x128xf32>
    %44 = arith.mulf %43, %26 : vector<8x128xf32>
    %c0_16 = arith.constant 0 : index
    %c384 = arith.constant 384 : index
    %45 = vector.load %arg6[%c0_16, %c384] : memref<8x512xf32, #tpu.memory_space<vmem>>, vector<8x128xf32>
    tpu.vector_store %arg6[%c0_16, %c384], %44 {strides = array<i32>} : memref<8x512xf32, #tpu.memory_space<vmem>>, vector<8x128xf32>,
    return
  }
  func.func @transform_0(%arg0: i32) -> (i32, i32) {
    %c0_i32 = arith.constant 0 : i32
    %c0_i32_0 = arith.constant 0 : i32
    %c0_i32_1 = arith.constant 0 : i32
    return %c0_i32, %c0_i32_0 : i32, i32
  }
  func.func @transform_1(%arg0: i32) -> (i32, i32) {
    %c0_i32 = arith.constant 0 : i32
    %c0_i32_0 = arith.constant 0 : i32
    %c0_i32_1 = arith.constant 0 : i32
    return %c0_i32, %c0_i32_0 : i32, i32
  }
  func.func @transform_2(%arg0: i32) -> (i32, i32) {
    %c0_i32 = arith.constant 0 : i32
    %c0_i32_0 = arith.constant 0 : i32
    %c0_i32_1 = arith.constant 0 : i32
    return %c0_i32, %c0_i32_0 : i32, i32
  }
  func.func @transform_3(%arg0: i32) -> (i32, i32) {
    %c0_i32 = arith.constant 0 : i32
    %c0_i32_0 = arith.constant 0 : i32
    %c0_i32_1 = arith.constant 0 : i32
    return %c0_i32, %c0_i32_0 : i32, i32
  }
  func.func @transform_4(%arg0: i32) -> (i32, i32) {
    %c0_i32 = arith.constant 0 : i32
    %c0_i32_0 = arith.constant 0 : i32
    %c0_i32_1 = arith.constant 0 : i32
    return %c0_i32, %c0_i32_0 : i32, i32
  }
  func.func @transform_5(%arg0: i32) -> (i32, i32) {
    %c0_i32 = arith.constant 0 : i32
    %c0_i32_0 = arith.constant 0 : i32
    %c0_i32_1 = arith.constant 0 : i32
    return %c0_i32, %c0_i32_0 : i32, i32
  }
}

</mosaic_0001>

<bundles_post_ra>
// kernel: share_lstm_cell_forward.1
= control target key start
LH: loop header
LB: loop body
LE: loop exit
PB: predicated region body
PF: predicated region fallthrough
CT: control target
= control target key end

     0   :  { %10 = vsyncpa [#allocation3], 0  ;;  %s567_s18 = smov [#allocation2]   ;;  %s640_s0 = inlined_call_operand.vmem [shape: bf16[8,80], index: 0, kind: input, shape index: {}]   ;;  %s641_s1 = inlined_call_operand.vmem [shape: f32[8,128], index: 1, kind: input, shape index: {}]   ;;  %s642_s2 = inlined_call_operand.vmem [shape: f32[8,1], index: 2, kind: input, shape index: {}]   ;;  %s643_s3 = inlined_call_operand.hbm [shape: bf16[80,768], index: 3, kind: input, shape index: {}]   ;;  %s644_s4 = inlined_call_operand.vmem [shape: f32[1,768], index: 4, kind: input, shape index: {}]   ;;  %s645_s5 = inlined_call_operand.vmem [shape: f32[8,512], index: 5, kind: output, shape index: {}]  }
   0x1   :  { %s22_s19 = sshll.u32 %s567_s18, 4  ;;  %s543_s22 = scalar_lea.hbm %s643_s3, 3840  ;;  %s23_s19 = int_to_ptr.vmem [resolvable:$true] %s22_s19 }
   0x2   :  { %p544_p0 = scmp.ne.s32.totalorder %s643_s3, %s543_s22  ;;  %p547_p1 = scmp.lt.u32.totalorder %s543_s22, %s643_s3 }
   0x4   :  { %p549_p2 = pnand %p547_p1, %p544_p0 }
   0x6   :  { %552 = shalt.err (!%p549_p2)
}
   0x7   :  { %s553_s27 = scalar_lea.vmem %s23_s19, 3840  ;;  %p558_p4 = scmp.lt.s32.totalorder %s23_s19, %s23_s19 }
   0x8   :  { %p554_p3 = scmp.ne.s32.totalorder %s23_s19, %s553_s27  ;;  %p559_p5 = scmp.lt.s32.totalorder %s553_s27, %s553_s27 }
   0xa   :  { %p560_p6 = por %p559_p5, %p558_p4 }
   0xc   :  { %p561_p7 = pnand %p560_p6, %p554_p3 }
   0xe   :  { %564 = shalt.err (!%p561_p7)
}
   0xf   :  { %s568_s28 = smov 384   ;;  %s569_s29 = smov 24  }
  0x10   :  { %28 = dma.hbm_to_vmem [thread:$0]  %s643_s3, 3840, %s23_s19, [#allocation3], %s568_s28, %s568_s28, %s569_s29  }
  0x11   :  { %565 = dma.done.wait [#allocation3], 3840  }
  0x12   :  { %566 = vsyncadd [#allocation3], 4294963456  ;;  %v570_v0 = vmov 0   ;;  %v474_v1 = vld [vmem:[#allocation2 + $0x4] ss:$24 sps:$4 sm:$0xff]   ;;  %vm248_vm0 = vcmask 654336   ;;  %v68_v33 = vlaneseq }
  0x13   :  { %284 = vmatprep.mubr.bf16.mxu0 %v570_v0  ;;  %325 = vmatprep.mubr.bf16.mxu1 %v570_v0  ;;  %v476_v2 = vld [vmem:[#allocation2] ss:$24 sps:$4 sm:$0xff]   ;;  %v477_v3 = vld [vmem:[#allocation2 + $0x34] ss:$24 sps:$4 sm:$0xff]   ;;  %v479_v4 = vld [vmem:[#allocation2 + $0x30] ss:$24 sps:$4 sm:$0xff]  }
  0x14   :  { %473 = vset.pattern.permute.xlu0 %v570_v0  ;;  %252 = vmatprep.subr.bf16.mxu0 %v474_v1  ;;  %v480_v5 = vld [vmem:[#allocation2 + $0x64] ss:$24 sps:$4 sm:$0xff]   ;;  %v488_v7 = vld [vmem:[#allocation2 + $0x8] ss:$24 sps:$4 sm:$0xff]   ;;  %v483_v9 = vld [vmem:[#allocation2 + $0x94] ss:$24 sps:$4 sm:$0xff]  }
  0x15   :  { %253 = vmatpush1.bf16.msra.mxu0 %v476_v2  ;;  %v486_v6 = vld [vmem:[#allocation2 + $0xc] ss:$24 sps:$4 sm:$0xff]   ;;  %v482_v8 = vld [vmem:[#allocation2 + $0x60] ss:$24 sps:$4 sm:$0xff]   ;;  %v492_v10 = vld [vmem:[#allocation2 + $0x3c] ss:$24 sps:$4 sm:$0xff]  }
  0x16   :  { %254 = vmatprep.subr.bf16.mxu0 %v477_v3  ;;  %293 = vmatprep.subr.bf16.mxu1 %v486_v6  ;;  %v494_v11 = vld [vmem:[#allocation2 + $0x38] ss:$24 sps:$4 sm:$0xff]   ;;  %v498_v13 = vld [vmem:[#allocation2 + $0x6c] ss:$24 sps:$4 sm:$0xff]   ;;  %v500_v15 = vld [vmem:[#allocation2 + $0x68] ss:$24 sps:$4 sm:$0xff]  }
  0x17   :  { %294 = vmatpush1.bf16.msra.mxu1 %v488_v7  ;;  %v485_v12 = vld [vmem:[#allocation2 + $0x90] ss:$24 sps:$4 sm:$0xff]   ;;  %v489_v14 = vld [vmem:[#allocation2 + $0xc4] ss:$24 sps:$4 sm:$0xff]   ;;  %v491_v17 = vld [vmem:[#allocation2 + $0xc0] ss:$24 sps:$4 sm:$0xff]  }
  0x18   :  { %295 = vmatprep.subr.bf16.mxu1 %v492_v10  ;;  %v504_v16 = vld [vmem:[#allocation2 + $0x9c] ss:$24 sps:$4 sm:$0xff]   ;;  %v506_v19 = vld [vmem:[#allocation2 + $0x98] ss:$24 sps:$4 sm:$0xff]   ;;  %v35_v20 = vld [vmem:[%s640_s0] sm:$0xf] }
  0x19   :  { %255 = vmatpush1.bf16.msra.mxu0 %v479_v4  ;;  %v497_v18 = vld [vmem:[#allocation2 + $0x14] ss:$24 sps:$4 sm:$0xff]   ;;  %v495_v22 = vld [vmem:[#allocation2 + $0x10] ss:$24 sps:$4 sm:$0xff]   ;;  %v503_v23 = vld [vmem:[#allocation2 + $0x44] ss:$24 sps:$4 sm:$0xff]  }
  0x1a   :  { %256 = vmatprep.subr.bf16.mxu0 %v480_v5  ;;  %v510_v21 = vld [vmem:[#allocation2 + $0xcc] ss:$24 sps:$4 sm:$0xff]   ;;  %v512_v25 = vld [vmem:[#allocation2 + $0xc8] ss:$24 sps:$4 sm:$0xff]   ;;  %v69_v34 = vshrl.u32 %v68_v33, 7 }
  0x1b   :  { %296 = vmatpush1.bf16.msra.mxu1 %v494_v11  ;;  %v393_v24 = vld [vmem:[%s642_s2] sm:$0xff]  ;;  %v509_v27 = vld [vmem:[#allocation2 + $0x74] ss:$24 sps:$4 sm:$0xff]   ;;  %v507_v28 = vld [vmem:[#allocation2 + $0x70] ss:$24 sps:$4 sm:$0xff]  }
  0x1c   :  { %297 = vmatprep.subr.bf16.mxu1 %v498_v13  ;;  %396 = vperm.xlu0 %473, %v393_v24   ;;  %v501_v26 = vld [vmem:[#allocation2 + $0x40] ss:$24 sps:$4 sm:$0xff]   ;;  %v515_v29 = vld [vmem:[#allocation2 + $0xa4] ss:$24 sps:$4 sm:$0xff]   ;;  %v518_v31 = vld [vmem:[#allocation2 + $0xd4] ss:$24 sps:$4 sm:$0xff]  }
  0x1d   :  { %257 = vmatpush1.bf16.msra.mxu0 %v482_v8  ;;  %v513_v30 = vld [vmem:[#allocation2 + $0xa0] ss:$24 sps:$4 sm:$0xff]   ;;  %v516_v32 = vld [vmem:[#allocation2 + $0xd0] ss:$24 sps:$4 sm:$0xff]   ;;  %v70_v35 = vsub.s32 0, %v69_v34  ;;  %v74_v37 = vsub.s32 1, %v69_v34 }
  0x1e   :  { %258 = vmatprep.subr.bf16.mxu0 %v483_v9  ;;  %v66_v36 = vld [vmem:[%s644_s4] sm:$0x3f]  ;;  %v78_v48 = vsub.s32 2, %v69_v34  ;;  %v82_v49 = vsub.s32 3, %v69_v34  ;;  %v86_v58 = vsub.s32 4, %v69_v34  ;;  %v90_v59 = vsub.s32 5, %v69_v34 }
  0x1f   :  { %298 = vmatpush1.bf16.msra.mxu1 %v500_v15  ;;  %v71_v38 = vrot.slane %v66_v36, %v70_v35  ;;  %v75_v39 = vrot.slane %v66_v36, %v74_v37 }
  0x20   :  { %299 = vmatprep.subr.bf16.mxu1 %v504_v16  ;;  %v79_v52 = vrot.slane %v66_v36, %v78_v48  ;;  %v83_v53 = vrot.slane %v66_v36, %v82_v49  ;;  %v87_v1 = vrot.slane %v66_v36, %v86_v58  ;;  %v91_v2 = vrot.slane %v66_v36, %v90_v59 }
  0x21   :  { %259 = vmatpush1.bf16.msra.mxu0 %v485_v12  ;;  %v399_v12 = vld [vmem:[%s641_s1] sm:$0xff] }
  0x22   :  { %260 = vmatprep.subr.bf16.mxu0 %v489_v14 }
  0x23   :  { %300 = vmatpush1.bf16.msra.mxu1 %v506_v19 }
  0x24   :  { %301 = vmatprep.subr.bf16.mxu1 %v510_v21 }
  0x25   :  { %261 = vmatpush1.bf16.msra.mxu0 %v491_v17 }
  0x26   :  { %334 = vmatprep.subr.bf16.mxu0 %v497_v18 }
  0x27   :  { %302 = vmatpush1.bf16.msra.mxu1 %v512_v25 }
  0x28   :  { %461 = vmatmul.mubr.msk.bf16.vlgmr.msra.gmra.mrb[0].mxu0 %vm248_vm0, %v35_v20 }
  0x29   :  { %335 = vmatpush1.bf16.msra.mxu0 %v495_v22  ;;  %366 = vmatprep.mubr.bf16.mxu0 %v570_v0 }
  0x2a   :  { %336 = vmatprep.subr.bf16.mxu0 %v503_v23  ;;  %462 = vmatmul.mubr.msk.bf16.vlgmr.msra.gmra.mrb[0].mxu1 %vm248_vm0, %v35_v20 }
  0x2d   :  { %337 = vmatpush1.bf16.msra.mxu0 %v501_v26 }
  0x2e   :  { %338 = vmatprep.subr.bf16.mxu0 %v509_v27 }
  0x31   :  { %339 = vmatpush1.bf16.msra.mxu0 %v507_v28 }
  0x32   :  { %340 = vmatprep.subr.bf16.mxu0 %v515_v29 }
  0x35   :  { %341 = vmatpush1.bf16.msra.mxu0 %v513_v30 }
  0x36   :  { %342 = vmatprep.subr.bf16.mxu0 %v518_v31 }
  0x39   :  { %343 = vmatpush1.bf16.msra.mxu0 %v516_v32 }
  0x3c   :  { %463 = vmatmul.mubr.msk.bf16.vlgmr.msra.gmra.mrb[4].mxu0 %vm248_vm0, %v35_v20 }
  0x9b   :  { %v397_v18 = vpop.permute.xlu0 %396 }
  0xfb   :  { %v286_v40 = vpop.f32.mrb[0].mxu0 }
  0xfc   :  { %v287_v41 = vadd.f32 %v286_v40, %v71_v38  ;;  %v288_v42 = vpop.f32.mrb[1].mxu0 }
  0xfd   :  { %v289_v43 = vadd.f32 %v288_v42, %v75_v39  ;;  %v290_v44 = vpop.f32.mrb[2].mxu0  ;;  %v327_v50 = vpop.f32.mrb[0].mxu1 }
  0xfe   :  { %v464_v45 = vmul.f32 -1.442695, %v287_v41  ;;  %v291_v46 = vpop.f32.mrb[3].mxu0  ;;  %v329_v51 = vpop.f32.mrb[1].mxu1  ;;  %v328_v56 = vadd.f32 %v327_v50, %v79_v52 }
  0xff   :  { %v465_v47 = vmul.f32 -1.442695, %v289_v43  ;;  %v331_v54 = vpop.f32.mrb[2].mxu1  ;;  %v330_v57 = vadd.f32 %v329_v51, %v83_v53 }
 0x100   :  { %519 = vpow2.f32 %v464_v45  ;;  %v332_v55 = vpop.f32.mrb[3].mxu1  ;;  %v466_v63 = vmul.f32 -1.442695, %v328_v56 }
 0x101   :  { %521 = vpow2.f32 %v465_v47 }
 0x102   :  { %523 = vtanh.f32 %v330_v57 }
 0x10a   :  { %v520_v60 = vpop.eup %519 }
 0x10b   :  { %v522_v61 = vpop.eup %521  ;;  %v384_v62 = vadd.f32 1.0, %v520_v60 }
 0x10c   :  { %v385_v0 = vadd.f32 1.0, %v522_v61  ;;  %v524_v11 = vpop.eup %523 }
 0x10d   :  { %525 = vrcp.f32 %v384_v62 }
 0x10e   :  { %527 = vrcp.f32 %v385_v0 }
 0x10f   :  { %529 = vpow2.f32 %v466_v63  ;;  %v368_v3 = vpop.f32.mrb[4].mxu0 }
 0x110   :  { %v369_v4 = vadd.f32 %v368_v3, %v87_v1  ;;  %v370_v5 = vpop.f32.mrb[5].mxu0 }
 0x111   :  { %v371_v6 = vadd.f32 %v370_v5, %v91_v2  ;;  %v372_v7 = vpop.f32.mrb[6].mxu0 }
 0x112   :  { %v467_v8 = vmul.f32 -1.442695, %v369_v4  ;;  %v373_v9 = vpop.f32.mrb[7].mxu0 }
 0x113   :  { %v468_v10 = vmul.f32 -1.442695, %v371_v6 }
 0x114   :  { %531 = vpow2.f32 %v467_v8 }
 0x115   :  { %533 = vpow2.f32 %v468_v10 }
 0x117   :  { %v526_v13 = vpop.eup %525 }
 0x118   :  { %v528_v14 = vpop.eup %527  ;;  %v402_v15 = vmul.f32 %v526_v13, %v524_v11 }
 0x119   :  { %v530_v16 = vpop.eup %529  ;;  %v400_v17 = vmul.f32 %v528_v14, %v399_v12 }
 0x11a   :  { %v386_v20 = vadd.f32 1.0, %v530_v16 }
 0x11b   :  { %v403_v19 = vadd.f32 %v402_v15, %v400_v17 }
 0x11d   :  { %v404_v21 = vmul.f32 %v403_v19, %v397_v18 }
 0x11e   :  { %v532_v22 = vpop.eup %531 }
 0x11f   :  { %v534_v23 = vpop.eup %533  ;;  %v413_v24 = vadd.f32 1.0, %v532_v22  ;;  %535 = vtanh.f32 %v404_v21  ;;  %409 = vst [vmem:[%s645_s5 + $0x8] sm:$0xff] %v404_v21 }
 0x120   :  { %537 = vrcp.f32 %v386_v20  ;;  %v421_v25 = vadd.f32 1.0, %v534_v23 }
 0x121   :  { %539 = vrcp.f32 %v413_v24 }
 0x122   :  { %541 = vrcp.f32 %v421_v25 }
 0x129   :  { %v536_v26 = vpop.eup %535 }
 0x12a   :  { %v538_v27 = vpop.eup %537  ;;  %v406_v28 = vmul.f32 %v536_v26, %v397_v18 }
 0x12b   :  { %v540_v29 = vpop.eup %539 }
 0x12c   :  { %v542_v30 = vpop.eup %541  ;;  %v407_v31 = vmul.f32 %v538_v27, %v406_v28  ;;  %v416_v32 = vmul.f32 %v540_v29, %v406_v28 }
 0x12d   :  { %v424_v33 = vmul.f32 %v542_v30, %v406_v28 }
 0x12e   :  { %408 = vst [vmem:[%s645_s5] sm:$0xff] %v407_v31  ;;  %417 = vst [vmem:[%s645_s5 + $0x10] sm:$0xff] %v416_v32 }
 0x12f   :  { %425 = vst [vmem:[%s645_s5 + $0x18] sm:$0xff] %v424_v33 }
 0x130   :  { %430 = vsyncpa [#allocation3], 1 }

</bundles_post_ra>
